<compile_context>
chip_gen: v7x
topology: tpu7x:2x2x1
jax: 0.10.0
libtpu: 0.0.40
codegen_flags: <defaults>
</compile_context>

<pallas_src>
import functools

import jax
import jax.numpy as jnp
from jax.experimental import pallas as pl
from jax.experimental.pallas import tpu as pltpu


def _conv_stats_kernel(x_ref, w_ref, y_ref, sum_ref, sq_ref, acc_ref, *, kw_taps, stride, ow):
    """One (n, oh) output row: accumulate KH x KW shifted matmuls, emit y + partial BN stats.

    x_ref  : (1, 1, Wp, Cin)        bf16  padded input row  ih = oh*stride + kh
    w_ref  : (KH, KW, Cin, Cout_p)  bf16  full weight, resident across the grid
    y_ref  : (1, 1, OW, Cout_p)     bf16  conv output row (pre-BN), written on the last kh
    sum_ref/sq_ref : (1, 1, 1, Cout_p) f32  per-(n, oh) partial sum / sum of squares
    acc_ref: (OW, Cout_p)           f32   scratch accumulator (lives across the kh axis)
    """
    kh = pl.program_id(2)

    @pl.when(kh == 0)
    def _():
        acc_ref[...] = jnp.zeros_like(acc_ref)

    x_row = x_ref[0, 0]                                   # (Wp, Cin) bf16
    part = None
    for kw in range(kw_taps):                             # static, unrolled
        a = x_row[kw:kw + stride * (ow - 1) + 1:stride, :]  # (OW, Cin) bf16
        d = jnp.dot(a, w_ref[kh, kw], preferred_element_type=jnp.float32)
        part = d if part is None else part + d
    acc_ref[...] += part

    @pl.when(kh == pl.num_programs(2) - 1)
    def _():
        y = acc_ref[...]                                  # (OW, Cout_p) f32
        y_ref[...] = y.astype(y_ref.dtype)[None, None]
        sum_ref[...] = jnp.sum(y, axis=0, keepdims=True)[None, None]
        sq_ref[...] = jnp.sum(y * y, axis=0, keepdims=True)[None, None]


def _bn_relu_kernel(y_ref, scale_ref, shift_ref, o_ref):
    """Fused BatchNorm (pre-folded scale/shift) + ReLU on a large lane-dense tile."""
    y = y_ref[...].astype(jnp.float32)                    # (tm, Cout_p)
    o_ref[...] = jnp.maximum(y * scale_ref[...] + shift_ref[...], 0.0)


def conv_block_forward(x, weight, bias, gamma, beta, *, stride, padding, eps=1e-5, tm_bn=512):
    """x: (N, Cin, H, W) f32; weight: (Cout, Cin, KH, KW); returns (N, Cout, OH, OW) f32."""
    # Conv bias cancels exactly under train-mode BatchNorm (mean absorbs it); drop it.
    del bias

    N, Cin, H, W = x.shape
    Cout, _, KH, KW = weight.shape
    OH = (H + 2 * padding - KH) // stride + 1
    OW = (W + 2 * padding - KW) // stride + 1
    Hp, Wp = H + 2 * padding, W + 2 * padding
    Cp = pl.cdiv(Cout, 128) * 128                         # lane-dense channel padding

    # ---- layout glue (plain JAX, ~1x input volume) --------------------------------
    x_pad = jnp.pad(jnp.transpose(x, (0, 2, 3, 1)),
                    ((0, 0), (padding, padding), (padding, padding), (0, 0)))
    x_pad = x_pad.astype(jnp.bfloat16)                    # bf16 MXU operand
    # (Cout, Cin, KH, KW) -> (KH, KW, Cin, Cout_p), lane-padded, bf16.
    w = jnp.transpose(weight, (2, 3, 1, 0))
    w = jnp.pad(w, ((0, 0), (0, 0), (0, 0), (0, Cp - Cout))).astype(jnp.bfloat16)

    # ---- Kernel 1: conv (KH*KW shifted matmuls) + per-(n, oh) partial BN stats -----
    kernel1 = functools.partial(_conv_stats_kernel, kw_taps=KW, stride=stride, ow=OW)
    y, psum, psq = pl.pallas_call(
        kernel1,
        out_shape=(
            jax.ShapeDtypeStruct((N, OH, OW, Cp), jnp.bfloat16),   # bf16 intermediate
            jax.ShapeDtypeStruct((N, OH, 1, Cp), jnp.float32),
            jax.ShapeDtypeStruct((N, OH, 1, Cp), jnp.float32),
        ),
        grid=(N, OH, KH),
        in_specs=[
            pl.BlockSpec((1, 1, Wp, Cin), lambda n, oh, kh: (n, oh * stride + kh, 0, 0)),
            pl.BlockSpec((KH, KW, Cin, Cp), lambda n, oh, kh: (0, 0, 0, 0)),  # resident weight
        ],
        out_specs=(
            pl.BlockSpec((1, 1, OW, Cp), lambda n, oh, kh: (n, oh, 0, 0)),
            pl.BlockSpec((1, 1, 1, Cp), lambda n, oh, kh: (n, oh, 0, 0)),
            pl.BlockSpec((1, 1, 1, Cp), lambda n, oh, kh: (n, oh, 0, 0)),
        ),
        scratch_shapes=[pltpu.VMEM((OW, Cp), jnp.float32)],
        compiler_params=pltpu.CompilerParams(
            dimension_semantics=("parallel", "parallel", "arbitrary")),
    )(x_pad, w)

    # ---- tiny JAX: reduce partial stats, fold BN into per-channel scale/shift ------
    cnt = float(N * OH * OW)
    mean = psum.sum(axis=(0, 1)) / cnt                    # (1, Cp)
    # Clamp guards against tiny negative values from the E[x^2]-E[x]^2 formulation.
    var = jnp.maximum(psq.sum(axis=(0, 1)) / cnt - mean * mean, 0.0)
    gamma_p = jnp.pad(gamma.astype(jnp.float32), ((0, Cp - Cout),)).reshape(1, Cp)
    beta_p = jnp.pad(beta.astype(jnp.float32), ((0, Cp - Cout),)).reshape(1, Cp)
    scale = gamma_p * jax.lax.rsqrt(var + eps)            # (1, Cp); 0 on padded channels
    shift = beta_p - mean * scale

    # ---- Kernel 2: BN (scale/shift) + ReLU on big lane-dense tiles ------------------
    M = N * OH * OW
    y2 = y.reshape(M, Cp)
    tm = min(tm_bn, pl.cdiv(M, 8) * 8)                    # multiple of 8 sublanes
    Mp = pl.cdiv(M, tm) * tm
    if Mp != M:
        y2 = jnp.pad(y2, ((0, Mp - M), (0, 0)))

    out_flat = pl.pallas_call(
        _bn_relu_kernel,
        out_shape=jax.ShapeDtypeStruct((Mp, Cp), jnp.float32),
        grid=(Mp // tm,),
        in_specs=[
            pl.BlockSpec((tm, Cp), lambda i: (i, 0)),
            pl.BlockSpec((1, Cp), lambda i: (0, 0)),
            pl.BlockSpec((1, Cp), lambda i: (0, 0)),
        ],
        out_specs=pl.BlockSpec((tm, Cp), lambda i: (i, 0)),
        compiler_params=pltpu.CompilerParams(dimension_semantics=("parallel",)),
    )(y2, scale, shift)

    out = out_flat[:M, :Cout].reshape(N, OH, OW, Cout)
    return jnp.transpose(out, (0, 3, 1, 2)).astype(x.dtype)   # back to NCHW


def _reference(x, weight, bias, gamma, beta, *, stride, padding, eps=1e-5):
    # Mirror the kernel's bf16 MXU operand quantization (accumulation stays f32 in both),
    # so the comparison isolates real bugs rather than expected mixed-precision rounding.
    xq = x.astype(jnp.bfloat16).astype(jnp.float32)
    wq = weight.astype(jnp.bfloat16).astype(jnp.float32)
    conv = jax.lax.conv_general_dilated(
        xq, wq, (stride, stride), [(padding, padding), (padding, padding)],
        dimension_numbers=("NCHW", "OIHW", "NCHW"),
        precision=jax.lax.Precision.HIGHEST,
    ) + bias.reshape(1, -1, 1, 1)
    mean = conv.mean(axis=(0, 2, 3), keepdims=True)
    var = ((conv - mean) ** 2).mean(axis=(0, 2, 3), keepdims=True)  # biased var (train mode)
    bn = (conv - mean) * jax.lax.rsqrt(var + eps) * gamma.reshape(1, -1, 1, 1) \
        + beta.reshape(1, -1, 1, 1)
    return jnp.maximum(bn, 0.0)


if __name__ == "__main__":
    key = jax.random.PRNGKey(0)
    k_x, k_w, k_b, k_g, k_be = jax.random.split(key, 5)

    N, Cin, H, W = 2, 4, 16, 16
    Cout, KH, KW = 8, 3, 3
    stride, padding = 1, 1

    x = jax.random.normal(k_x, (N, Cin, H, W), dtype=jnp.float32)
    weight = jax.random.normal(k_w, (Cout, Cin, KH, KW), dtype=jnp.float32) * 0.1
    bias = jax.random.normal(k_b, (Cout,), dtype=jnp.float32) * 0.1
    # PyTorch BatchNorm2d init is gamma=1, beta=0; perturb deterministically to exercise affine.
    gamma = 1.0 + 0.1 * jax.random.normal(k_g, (Cout,), dtype=jnp.float32)
    beta = 0.1 * jax.random.normal(k_be, (Cout,), dtype=jnp.float32)

    out = conv_block_forward(x, weight, bias, gamma, beta, stride=stride, padding=padding)
    out = jax.block_until_ready(out)

    ref = _reference(x, weight, bias, gamma, beta, stride=stride, padding=padding)
    assert out.shape == ref.shape, (out.shape, ref.shape)
    err = float(jnp.max(jnp.abs(out - ref)))
    assert jnp.allclose(out, ref, atol=1e-2, rtol=1e-2), err

    print("KERNEL_OK")
</pallas_src>

<mosaic_0001>
module attributes {stable_mosaic.version = 11 : i64} {
  func.func @_conv_stats_kernel(%arg0: i32, %arg1: i32, %arg2: i32, %arg3: memref<1x1x18x4xbf16, #tpu.memory_space<vmem>>, %arg4: memref<3x3x4x128xbf16, #tpu.memory_space<vmem>>, %arg5: memref<1x1x16x128xbf16, #tpu.memory_space<vmem>>, %arg6: memref<1x1x1x128xf32, #tpu.memory_space<vmem>>, %arg7: memref<1x1x1x128xf32, #tpu.memory_space<vmem>>, %arg8: memref<16x128xf32, #tpu.memory_space<vmem>>) attributes {dimension_semantics = [#tpu.dimension_semantics<parallel>, #tpu.dimension_semantics<parallel>, #tpu.dimension_semantics<arbitrary>], iteration_bounds = array<i64: 2, 16, 3>, scalar_prefetch = 0 : i64, scratch_operands = 1 : i64, tpu.core_type = #tpu.core_type<tc>, window_params = [{transform_indices = @transform_0, window_bounds = array<i64: 1, 1, 18, 4>}, {pipeline_mode = #tpu.pipeline_mode<synchronous>, transform_indices = @transform_1, window_bounds = array<i64: 3, 3, 4, 128>}, {transform_indices = @transform_2, window_bounds = array<i64: 1, 1, 16, 128>}, {transform_indices = @transform_3, window_bounds = array<i64: 1, 1, 1, 128>}, {transform_indices = @transform_4, window_bounds = array<i64: 1, 1, 1, 128>}]} {
    %c0_i32 = arith.constant 0 : i32
    %0 = arith.cmpi eq, %arg2, %c0_i32 : i32
    %1 = arith.extui %0 : i1 to i32
    %c0_i32_0 = arith.constant 0 : i32
    %2 = arith.cmpi ne, %1, %c0_i32_0 : i32
    scf.if %2 {
      %cst_18 = arith.constant 0.000000e+00 : f32
      %28 = vector.broadcast %cst_18 : f32 to vector<16x128xf32>
      %c0_19 = arith.constant 0 : index
      %c0_20 = arith.constant 0 : index
      %29 = vector.load %arg8[%c0_19, %c0_20] : memref<16x128xf32, #tpu.memory_space<vmem>>, vector<16x128xf32>
      tpu.vector_store %arg8[%c0_19, %c0_20], %28 {strides = array<i32>} : memref<16x128xf32, #tpu.memory_space<vmem>>, vector<16x128xf32>,
    } else {
    }
    %c0 = arith.constant 0 : index
    %c0_1 = arith.constant 0 : index
    %c0_2 = arith.constant 0 : index
    %c0_3 = arith.constant 0 : index
    %3 = vector.load %arg3[%c0, %c0_1, %c0_2, %c0_3] : memref<1x1x18x4xbf16, #tpu.memory_space<vmem>>, vector<1x1x18x4xbf16>
    %4 = vector.shape_cast %3 : vector<1x1x18x4xbf16> to vector<18x4xbf16>
    %5 = vector.extract_strided_slice %4 {offsets = [0, 0], sizes = [16, 4], strides = [1, 1]} : vector<18x4xbf16> to vector<16x4xbf16>
    %6 = arith.index_cast %arg2 : i32 to index
    %c0_4 = arith.constant 0 : index
    %c0_5 = arith.constant 0 : index
    %c0_6 = arith.constant 0 : index
    %7 = vector.load %arg4[%6, %c0_4, %c0_5, %c0_6] : memref<3x3x4x128xbf16, #tpu.memory_space<vmem>>, vector<1x1x4x128xbf16>
    %8 = vector.shape_cast %7 : vector<1x1x4x128xbf16> to vector<4x128xbf16>
    %cst = arith.constant dense<0.000000e+00> : vector<16x128xf32>
    %9 = tpu.matmul %5, %8, %cst {dimension_numbers = #tpu.dot_dimension_numbers<[1], [0], [0], [1], [0, 0, 1, 1], [], []>} : vector<16x4xbf16>, vector<4x128xbf16>, vector<16x128xf32> -> vector<16x128xf32>
    %10 = vector.extract_strided_slice %4 {offsets = [1, 0], sizes = [16, 4], strides = [1, 1]} : vector<18x4xbf16> to vector<16x4xbf16>
    %11 = arith.index_cast %arg2 : i32 to index
    %c1 = arith.constant 1 : index
    %c0_7 = arith.constant 0 : index
    %c0_8 = arith.constant 0 : index
    %12 = vector.load %arg4[%11, %c1, %c0_7, %c0_8] : memref<3x3x4x128xbf16, #tpu.memory_space<vmem>>, vector<1x1x4x128xbf16>
    %13 = vector.shape_cast %12 : vector<1x1x4x128xbf16> to vector<4x128xbf16>
    %cst_9 = arith.constant dense<0.000000e+00> : vector<16x128xf32>
    %14 = tpu.matmul %10, %13, %cst_9 {dimension_numbers = #tpu.dot_dimension_numbers<[1], [0], [0], [1], [0, 0, 1, 1], [], []>} : vector<16x4xbf16>, vector<4x128xbf16>, vector<16x128xf32> -> vector<16x128xf32>
    %15 = arith.addf %9, %14 : vector<16x128xf32>
    %16 = vector.extract_strided_slice %4 {offsets = [2, 0], sizes = [16, 4], strides = [1, 1]} : vector<18x4xbf16> to vector<16x4xbf16>
    %17 = arith.index_cast %arg2 : i32 to index
    %c2 = arith.constant 2 : index
    %c0_10 = arith.constant 0 : index
    %c0_11 = arith.constant 0 : index
    %18 = vector.load %arg4[%17, %c2, %c0_10, %c0_11] : memref<3x3x4x128xbf16, #tpu.memory_space<vmem>>, vector<1x1x4x128xbf16>
    %19 = vector.shape_cast %18 : vector<1x1x4x128xbf16> to vector<4x128xbf16>
    %cst_12 = arith.constant dense<0.000000e+00> : vector<16x128xf32>
    %20 = tpu.matmul %16, %19, %cst_12 {dimension_numbers = #tpu.dot_dimension_numbers<[1], [0], [0], [1], [0, 0, 1, 1], [], []>} : vector<16x4xbf16>, vector<4x128xbf16>, vector<16x128xf32> -> vector<16x128xf32>
    %21 = arith.addf %15, %20 : vector<16x128xf32>
    %c0_13 = arith.constant 0 : index
    %c0_14 = arith.constant 0 : index
    %22 = vector.load %arg8[%c0_13, %c0_14] : memref<16x128xf32, #tpu.memory_space<vmem>>, vector<16x128xf32>
    %23 = arith.addf %22, %21 : vector<16x128xf32>
    %c0_15 = arith.constant 0 : index
    %c0_16 = arith.constant 0 : index
    %24 = vector.load %arg8[%c0_15, %c0_16] : memref<16x128xf32, #tpu.memory_space<vmem>>, vector<16x128xf32>
    tpu.vector_store %arg8[%c0_15, %c0_16], %23 {strides = array<i32>} : memref<16x128xf32, #tpu.memory_space<vmem>>, vector<16x128xf32>,
    %c2_i32 = arith.constant 2 : i32
    %25 = arith.cmpi eq, %arg2, %c2_i32 : i32
    %26 = arith.extui %25 : i1 to i32
    %c0_i32_17 = arith.constant 0 : i32
    %27 = arith.cmpi ne, %26, %c0_i32_17 : i32
    scf.if %27 {
      %c0_18 = arith.constant 0 : index
      %c0_19 = arith.constant 0 : index
      %28 = vector.load %arg8[%c0_18, %c0_19] : memref<16x128xf32, #tpu.memory_space<vmem>>, vector<16x128xf32>
      %29 = arith.truncf %28 : vector<16x128xf32> to vector<16x128xbf16>
      %30 = vector.shape_cast %29 : vector<16x128xbf16> to vector<1x1x16x128xbf16>
      %c0_20 = arith.constant 0 : index
      %c0_21 = arith.constant 0 : index
      %c0_22 = arith.constant 0 : index
      %c0_23 = arith.constant 0 : index
      %31 = vector.load %arg5[%c0_20, %c0_21, %c0_22, %c0_23] : memref<1x1x16x128xbf16, #tpu.memory_space<vmem>>, vector<1x1x16x128xbf16>
      tpu.vector_store %arg5[%c0_20, %c0_21, %c0_22, %c0_23], %30 {strides = array<i32>} : memref<1x1x16x128xbf16, #tpu.memory_space<vmem>>, vector<1x1x16x128xbf16>,
      %cst_24 = arith.constant dense<0.000000e+00> : vector<128xf32>
      %32 = vector.multi_reduction <add>, %28, %cst_24 [0] : vector<16x128xf32> to vector<128xf32>
      %33 = vector.shape_cast %32 : vector<128xf32> to vector<1x128xf32>
      %34 = vector.shape_cast %33 : vector<1x128xf32> to vector<1x1x1x128xf32>
      %c0_25 = arith.constant 0 : index
      %c0_26 = arith.constant 0 : index
      %c0_27 = arith.constant 0 : index
      %c0_28 = arith.constant 0 : index
      %35 = vector.load %arg6[%c0_25, %c0_26, %c0_27, %c0_28] : memref<1x1x1x128xf32, #tpu.memory_space<vmem>>, vector<1x1x1x128xf32>
      tpu.vector_store %arg6[%c0_25, %c0_26, %c0_27, %c0_28], %34 {strides = array<i32>} : memref<1x1x1x128xf32, #tpu.memory_space<vmem>>, vector<1x1x1x128xf32>,
      %36 = arith.mulf %28, %28 : vector<16x128xf32>
      %cst_29 = arith.constant dense<0.000000e+00> : vector<128xf32>
      %37 = vector.multi_reduction <add>, %36, %cst_29 [0] : vector<16x128xf32> to vector<128xf32>
      %38 = vector.shape_cast %37 : vector<128xf32> to vector<1x128xf32>
      %39 = vector.shape_cast %38 : vector<1x128xf32> to vector<1x1x1x128xf32>
      %c0_30 = arith.constant 0 : index
      %c0_31 = arith.constant 0 : index
      %c0_32 = arith.constant 0 : index
      %c0_33 = arith.constant 0 : index
      %40 = vector.load %arg7[%c0_30, %c0_31, %c0_32, %c0_33] : memref<1x1x1x128xf32, #tpu.memory_space<vmem>>, vector<1x1x1x128xf32>
      tpu.vector_store %arg7[%c0_30, %c0_31, %c0_32, %c0_33], %39 {strides = array<i32>} : memref<1x1x1x128xf32, #tpu.memory_space<vmem>>, vector<1x1x1x128xf32>,
    } else {
    }
    return
  }
  func.func @transform_0(%arg0: i32, %arg1: i32, %arg2: i32) -> (i32, i32, i32, i32) {
    %c1_i32 = arith.constant 1 : i32
    %0 = arith.muli %arg1, %c1_i32 : i32
    %1 = arith.addi %0, %arg2 : i32
    %c0_i32 = arith.constant 0 : i32
    %c0_i32_0 = arith.constant 0 : i32
    %c0_i32_1 = arith.constant 0 : i32
    return %arg0, %1, %c0_i32, %c0_i32_0 : i32, i32, i32, i32
  }
  func.func @transform_1(%arg0: i32, %arg1: i32, %arg2: i32) -> (i32, i32, i32, i32) {
    %c0_i32 = arith.constant 0 : i32
    %c0_i32_0 = arith.constant 0 : i32
    %c0_i32_1 = arith.constant 0 : i32
    %c0_i32_2 = arith.constant 0 : i32
    %c0_i32_3 = arith.constant 0 : i32
    return %c0_i32, %c0_i32_0, %c0_i32_1, %c0_i32_2 : i32, i32, i32, i32
  }
  func.func @transform_2(%arg0: i32, %arg1: i32, %arg2: i32) -> (i32, i32, i32, i32) {
    %c0_i32 = arith.constant 0 : i32
    %c0_i32_0 = arith.constant 0 : i32
    %c0_i32_1 = arith.constant 0 : i32
    return %arg0, %arg1, %c0_i32, %c0_i32_0 : i32, i32, i32, i32
  }
  func.func @transform_3(%arg0: i32, %arg1: i32, %arg2: i32) -> (i32, i32, i32, i32) {
    %c0_i32 = arith.constant 0 : i32
    %c0_i32_0 = arith.constant 0 : i32
    %c0_i32_1 = arith.constant 0 : i32
    return %arg0, %arg1, %c0_i32, %c0_i32_0 : i32, i32, i32, i32
  }
  func.func @transform_4(%arg0: i32, %arg1: i32, %arg2: i32) -> (i32, i32, i32, i32) {
    %c0_i32 = arith.constant 0 : i32
    %c0_i32_0 = arith.constant 0 : i32
    %c0_i32_1 = arith.constant 0 : i32
    return %arg0, %arg1, %c0_i32, %c0_i32_0 : i32, i32, i32, i32
  }
}

</mosaic_0001>

<bundles_post_ra>
// kernel: tpu_custom_call.1
= control target key start
LH: loop header
LB: loop body
LE: loop exit
PB: predicated region body
PF: predicated region fallthrough
CT: control target
= control target key end

     0   :  { %s1335_s0 = inlined_call_operand.vmem [shape: bf16[2,18,18,4], index: 0, kind: input, shape index: {}]   ;;  %s1336_s1 = inlined_call_operand.vmem [shape: bf16[3,3,4,128], index: 1, kind: input, shape index: {}]   ;;  %s1337_s2 = inlined_call_operand.hbm [shape: bf16[2,16,16,128], index: 2, kind: output, shape index: {0}]   ;;  %s1338_s3 = inlined_call_operand.hbm [shape: f32[2,16,1,128], index: 3, kind: output, shape index: {1}]   ;;  %s1339_s4 = inlined_call_operand.hbm [shape: f32[2,16,1,128], index: 4, kind: output, shape index: {2}]  }
   0x1   :  { %1347 = sst [smem:[#allocation14_spill]] %s1335_s0 }
   0x2   :  { %1348 = sst [smem:[#allocation15_spill]] %s1336_s1 }
   0x3   :  { %10 = vsyncpa [#allocation4], 0 }
   0x4   :  { %12 = vsyncpa [#allocation4 + $0x1], 0 }
   0x5   :  { %13 = vsyncpa [#allocation6], 0 }
   0x6   :  { %15 = vsyncpa [#allocation6 + $0x1], 0  ;;  %s1075_s15 = smov 0   ;;  %s1077_s16 = smov 0  }
   0x7   :  { %s1079_s17 = smov 0   ;;  %s1081_s18 = smov 0  }
   0x8   :  { %s1083_s19 = smov 0   ;;  %s1085_s20 = smov 0  }
   0x9   :  { %s1087_s21 = smov 0   ;;  %s1089_s22 = smov 0  }
   0xa   :  { %s1091_s23 = smov 0   ;;  %s1093_s24 = smov 0  }
   0xb LB: > { %1349 = sst [smem:[#allocation10_spill]] %s1036_s23  ;;  %s1341_s25 = sadd.s32 4294967295, %s1040_s24   ;;  %s1040_s24 = sphi %s1093_s24, %s21_s24   ;;  %s1036_s23 = sphi %s1091_s23, %s1364_s23   ;;  %s1032_s22 = sphi %s1089_s22, %s1371_s22   ;;  %s1028_s21 = sphi %s1087_s21, %s1370_s21   ;;  %s1024_s20 = sphi %s1085_s20, %s1361_s20   ;;  %s1020_s19 = sphi %s1083_s19, %s1369_s19   ;;  %s1016_s18 = sphi %s1081_s18, %s1368_s18   ;;  %s1012_s17 = sphi %s1079_s17, %s1367_s17   ;;  %s1008_s16 = sphi %s1077_s16, %s1366_s16   ;;  %s1004_s15 = sphi %s1075_s15, %s1365_s15  }
   0xc   : > { %s1340_s26 = sadd.s32 4294967294, %s1040_s24   ;;  %s33_s27 = sadd.s32 1, %s1028_s21 }
   0xd   : > { %p34_p0 = scmp.ge.s32.totalorder %s33_s27, 3  ;;  %s36_s28 = sadd.s32 1, %s1032_s22 }
   0xe   : > { %s40_s29 = sadd.s32 1, %s1036_s23  ;;  %p110_p1 = scmp.ne.s32.totalorder %s1012_s17, %s1008_s16 }
   0xf   : > { %s1373_s27 = smov (%p34_p0, %s33_s27), 0  ;;  %s1375_s28 = smov (!%p34_p0, %s36_s28), %s1032_s22 }
  0x10   : > { %1350 = sst [smem:[#allocation11_spill]] %s1373_s27  ;;  %p111_p2 = scmp.eq.s32.totalorder %s1341_s25, 95 }
  0x11   : > { %p116_p3 = scmp.ne.s32.totalorder %s1008_s16, %s1004_s15  ;;  %p38_p4 = scmp.ge.s32.totalorder %s1375_s28, 16 }
  0x12   : > { %p117_p5 = scmp.eq.s32.totalorder %s1340_s26, 95  ;;  %p1141_p6 = por %p111_p2, %p110_p1 }
  0x13   : > { %s1377_s28 = smov (%p38_p4, %s1375_s28), 0  ;;  %s1379_s29 = smov (!%p38_p4, %s40_s29), %s1036_s23 }
  0x14   : > { %1352 = sst [smem:[#allocation12_spill]] %s1377_s28  ;;  %p1148_p7 = por %p117_p5, %p116_p3 }
  0x15   : > { %p705_p8 = scmp.ge.s32.totalorder %s1040_s24, 1  ;;  %p42_p9 = scmp.ge.s32.totalorder %s1379_s29, 2 }
  0x16   : > { %p208_p10 = scmp.lt.s32.totalorder %s1040_s24, 97  ;;  %s96_s6 = ssub.s32 %s1032_s22, %s1377_s28 }
  0x17   : > { %s1381_s29 = smov (%p42_p9, %s1379_s29), 0  ;;  %s100_s9 = sadd.s32 1, %s1012_s17 }
  0x18   : > { %1354 = sst [smem:[#allocation13_spill]] %s1381_s29  ;;  %p209_p11 = pnand %p705_p8, %p208_p10 }
  0x19   : > { %s95_s7 = ssub.s32 %s1036_s23, %s1381_s29  ;;  %s1165_s11 = sand.u32 (!%p209_p11), 1, %s1008_s16  }
  0x1a   : > { %s97_s8 = sor.u32 %s96_s6, %s95_s7  ;;  %212 = sbr.rel (%p209_p11) target bundleno = 381 (0x17d), region = 28 }
  0x1b   : > { %p98_p12 = scmp.eq.s32.totalorder %s97_s8, 0  ;;  %s247_s12 = sadd.s32 (!%p209_p11), %s1016_s18, %s1020_s19 }
  0x1c   : > { %s706_s13 = sshll.u32 (!%p209_p11), %s1165_s11, 3  ;;  %p248_p13 = scmp.lt.s32.totalorder (!%p209_p11), %s1024_s20, 1 }
  0x1d   : > { %s1162_s10 = scalar_select %p98_p12, %s1012_s17, %s100_s9  }
  0x1e   : > { %p250_p0 = scmp.lt.s32.totalorder (!%p209_p11), %s247_s12, 17  ;;  %s1355_s0 = sld [smem:[#allocation14_spill]] (!%p209_p11) }
  0x1f   : > { %s1175_s28 = scalar_lea.vmem (!%p209_p11), [#allocation3], %s706_s13  ;;  %s240_s27 = scalar_lea.vmem (!%p209_p11), [#allocation5], %s1165_s11 }
  0x20   : > { %s1345_s23 = scalar_lea.vmem (!%p209_p11), [#allocation7], %s1165_s11  ;;  %p708_p1 = scmp.ne.s32.totalorder (!%p209_p11), %s1016_s18, 0 }
  0x21   : > { %s249_s14 = scalar_select %p248_p13, %s1024_s20, 1 }
  0x22   : > { %s1383_s12 = smov (!%p250_p0, %s247_s12), 17  ;;  %262 = sbr.rel (%p708_p1) target bundleno = 41 (0x29), region = 32 }
  0x23   : > { %s765_s6 = smul.u32 54, %s249_s14  ;;  %v1042_v0 = vmov (!%p708_p1), 0.0  }
  0x24   : > { %s764_s7 = smul.u32 3, %s1383_s12  ;;  %263 = vst [vmem:[#allocation2] sm:$0xff] (!%p708_p1), %v1042_v0  ;;  %264 = vst [vmem:[#allocation2 + $0x8] sm:$0xff] (!%p708_p1), %v1042_v0 }
  0x26   : > { %s254_s8 = sadd.s32 %s765_s6, %s764_s7 }
  0x27   : > { %s707_s9 = sshll.u32 %s254_s8, 2 }
  0x28   : > { %s256_s29 = scalar_lea.vmem %s1355_s0, %s707_s9 }
  0x29 PF: > { %s732_s14 = smul.u32 6, %s1016_s18  ;;  %v1043_v1 = vmov 0.0   ;;  %vm301_vm0 = vcmask 1041408   ;;  %v868_v2 = vld [vmem:[%s256_s29] sm:$0xff]   ;;  %s1356_s1 = sld [smem:[#allocation15_spill]]  ;;  %vm1044_vm1 = vmmov 0  }
  0x2a   : > { %746 = vmatprep.subr.bf16.mxu0 %v1043_v1  ;;  %752 = vmatprep.subr.bf16.mxu1 %v1043_v1  ;;  %v869_v3 = vld [vmem:[%s256_s29 + $0x8] ss:$0 sps:$4 sm:$0x11]   ;;  %v286_v6 = vshrl.u32 %v868_v2, 16  ;;  %v288_v7 = vshll.u32 %v868_v2, 16  ;;  %vm297_vm2 = vcmask 31744  }
  0x2b   : > { %748 = vmatprep.mubr.msk.bf16.mxu0 %vm1044_vm1, %v1043_v1  ;;  %754 = vmatprep.mubr.msk.bf16.mxu1 %vm1044_vm1, %v1043_v1  ;;  %v293_v10 = vshll.u32 %v869_v3, 16  ;;  %vm284_vm3 = vsmask.f32 7424  ;;  %v397_v17 = vrot.slane %v868_v2, 1  ;;  %v398_v18 = vrot.slane %v869_v3, 1  ;;  %v449_v31 = vld [vmem:[#allocation2] sm:$0xff] }
  0x2c   : > { %v290_v11 = vrot.slane %v288_v7, 1  ;;  %vm396_vm4 = vcmask 1046528   ;;  %v450_v35 = vld [vmem:[#allocation2 + $0x8] sm:$0xff]  ;;  %p719_p2 = scmp.ne.s32.totalorder %s1016_s18, 2 }
  0x2d   : > { %v295_v13 = vrot.slane %v293_v10, 1  ;;  %v399_v19 = vsel %vm396_vm4, %v397_v17, %v398_v18 }
  0x2e   : > { %v291_v14 = vor.u32 %v290_v11, %v286_v6 }
  0x2f   : > { %s270_s12 = scalar_lea.vmem %s1356_s1, %s732_s14 }
  0x30   : > { %v711_v4 = vld [vmem:[%s270_s12 + $0x2] sm:$0x3]  ;;  %v271_v5 = vld [vmem:[%s270_s12] sm:$0x3]  ;;  %v717_v12 = vld [vmem:[%s270_s12 + $0x4] sm:$0x3]  ;;  %v296_v16 = vsel %vm284_vm3, %v291_v14, %v295_v13 }
  0x31   : > { %v303_v8 = vsel %vm301_vm0, %v711_v4, 0  ;;  %v349_v9 = vsel %vm301_vm0, %v271_v5, 0  ;;  %v404_v15 = vsel %vm301_vm0, %v717_v12, 0 }
  0x32   : > { %747 = vmatpush3.bf16.msra.mxu0 %v303_v8  ;;  %753 = vmatpush3.bf16.msra.mxu1 %v349_v9 }
  0x33   : > { %758 = vmatprep.subr.bf16.mxu0 %v1043_v1 }
  0x35   : > { %755 = vmatmul.mubr.msk.bf16.vlgmr.msra.gmra.mrb[0].mxu1 %vm297_vm2, %v868_v2  ;;  %749 = vmatmul.mubr.msk.bf16.vlgmr.msra.gmra.mrb[0].mxu0 %vm297_vm2, %v296_v16 }
  0x36   : > { %759 = vmatpush3.bf16.msra.mxu0 %v404_v15  ;;  %760 = vmatprep.mubr.msk.bf16.mxu0 %vm1044_vm1, %v1043_v1 }
  0x3d   : > { %761 = vmatmul.mubr.msk.bf16.vlgmr.msra.gmra.mrb[4].mxu0 %vm297_vm2, %v399_v19 }
 0x108   : > { %v385_v20 = vpop.f32.mrb[0].mxu1  ;;  %v339_v22 = vpop.f32.mrb[0].mxu0 }
 0x109   : > { %v756_v21 = vpop.f32.mrb[1].mxu1  ;;  %v386_v24 = vadd.f32 %v385_v20, %v339_v22  ;;  %v750_v25 = vpop.f32.mrb[1].mxu0 }
 0x10a   : > { %v388_v23 = vpop.f32.mrb[2].mxu1  ;;  %v342_v27 = vpop.f32.mrb[2].mxu0 }
 0x10b   : > { %v757_v26 = vpop.f32.mrb[3].mxu1  ;;  %v389_v28 = vadd.f32 %v388_v23, %v342_v27  ;;  %v751_v29 = vpop.f32.mrb[3].mxu0 }
 0x110   : > { %v440_v30 = vpop.f32.mrb[4].mxu0 }
 0x111   : > { %v447_v32 = vadd.f32 %v440_v30, %v386_v24  ;;  %v762_v33 = vpop.f32.mrb[5].mxu0  ;;  %458 = sbr.rel (%p719_p2) target bundleno = 304 (0x130), region = 36 }
 0x112   : > { %v443_v34 = vpop.f32.mrb[6].mxu0 }
 0x113   : > { %v451_v36 = vadd.f32 %v449_v31, %v447_v32  ;;  %v448_v37 = vadd.f32 %v443_v34, %v389_v28  ;;  %v763_v38 = vpop.f32.mrb[7].mxu0 }
 0x115   : > { %453 = vst [vmem:[#allocation2] sm:$0xff] %v451_v36  ;;  %v452_v39 = vadd.f32 %v450_v35, %v448_v37 }
 0x117   : > { %454 = vst [vmem:[#allocation2 + $0x8] sm:$0xff] %v452_v39 }
 0x11c   : > { %v459_v40 = vld [vmem:[#allocation2] sm:$0xff] }
 0x11d   : > { %v479_v44 = vmul.f32 %v459_v40, %v459_v40 }
 0x11e   : > { %v460_v41 = vld [vmem:[#allocation2 + $0x8] sm:$0xff] }
 0x11f   : > { %v738_v42 = vpack.c.bf16 %v460_v41, %v459_v40  ;;  %v471_v43 = vadd.f32 %v460_v41, %v459_v40  ;;  %v480_v45 = vmul.f32 %v460_v41, %v460_v41 }
 0x121   : > { %739 = vst [vmem:[%s1175_s28] sm:$0xff] %v738_v42   ;;  %v472_v46 = vrot.slane %v471_v43, 4  ;;  %v481_v47 = vadd.f32 %v480_v45, %v479_v44 }
 0x123   : > { %v473_v48 = vadd.f32 %v472_v46, %v471_v43  ;;  %v482_v49 = vrot.slane %v481_v47, 4 }
 0x125   : > { %v474_v50 = vrot.slane %v473_v48, 2  ;;  %v483_v51 = vadd.f32 %v482_v49, %v481_v47 }
 0x127   : > { %v475_v52 = vadd.f32 %v474_v50, %v473_v48  ;;  %v484_v53 = vrot.slane %v483_v51, 2 }
 0x129   : > { %v476_v54 = vrot.slane %v475_v52, 1  ;;  %v485_v55 = vadd.f32 %v484_v53, %v483_v51 }
 0x12b   : > { %v477_v56 = vadd.f32 %v476_v54, %v475_v52  ;;  %v486_v57 = vrot.slane %v485_v55, 1 }
 0x12d   : > { %478 = vst [vmem:[%s240_s27] sm:$0x1] %v477_v56  ;;  %v487_v58 = vadd.f32 %v486_v57, %v485_v55 }
 0x12f   : > { %488 = vst [vmem:[%s1345_s23] sm:$0x1] %v487_v58 }
 0x130 PF: > { %s1357_s18 = sadd.s32 4294967295, %s1040_s24   ;;  %s726_s13 = sshll.u32 %s1024_s20, 4 }
 0x131   : > { %s1201_s29 = sand.u32 1, %s1357_s18   ;;  %s1205_s6 = sadd.s32 %s1020_s19, %s726_s13 }
 0x132   : > { %s1346_s7 = sshll.u32 %s1205_s6, 4  ;;  %s531_s8 = sshll.u32 %s240_s27, 4  ;;  %s532_s8 = int_to_ptr.vmem [resolvable:$true] %s531_s8 }
 0x133   : > { %s1215_s25 = scalar_lea.hbm %s1338_s3, %s1346_s7  ;;  %s495_s26 = scalar_lea.sflag [#allocation6], %s1201_s29 }
 0x134   : > { %s870_s12 = scalar_lea.vmem %s532_s8, 16  ;;  %s1045_s18 = smov [#allocation5]  }
 0x135   : > { %p871_p3 = scmp.ne.s32.totalorder %s532_s8, %s870_s12  ;;  %s874_s13 = sshll.u32 %s1045_s18, 4  ;;  %s875_s13 = int_to_ptr.vmem [resolvable:$false] %s874_s13 }
 0x136   : > { %s876_s23 = scalar_lea.vmem %s875_s13, 32  ;;  %p877_p8 = scmp.lt.s32.totalorder %s532_s8, %s875_s13 }
 0x137   : > { %p872_p4 = pnand %p871_p3, %p1141_p6  ;;  %p878_p9 = scmp.lt.s32.totalorder %s876_s23, %s870_s12 }
 0x139   : > { %p873_p5 = pneg %p872_p4  ;;  %p879_p10 = por %p878_p9, %p877_p8 }
 0x13b   : > { %p880_p11 = pnand %p879_p10, %p873_p5 }
 0x13d   : > { %883 = shalt.err (!%p880_p11)
}
 0x13e   : > { %s884_s27 = scalar_lea.hbm %s1215_s25, 16  ;;  %s888_s18 = scalar_lea.hbm %s1338_s3, 512 }
 0x13f   : > { %p885_p12 = scmp.ne.s32.totalorder %s1215_s25, %s884_s27  ;;  %p889_p1 = scmp.lt.u32.totalorder %s1215_s25, %s1338_s3 }
 0x140   : > { %p890_p2 = scmp.lt.u32.totalorder %s888_s18, %s884_s27  ;;  %p892_p4 = scmp.lt.u32.totalorder %s884_s27, %s1215_s25 }
 0x141   : > { %p886_p13 = pnand %p885_p12, %p1141_p6 }
 0x142   : > { %p891_p3 = por %p890_p2, %p889_p1 }
 0x143   : > { %p887_p0 = pneg %p886_p13 }
 0x144   : > { %p893_p5 = por %p892_p4, %p891_p3 }
 0x146   : > { %p894_p8 = pnand %p893_p5, %p887_p0 }
 0x148   : > { %897 = shalt.err (!%p894_p8)
}
 0x149   : > { %767 = dma.vmem_to_hbm [thread:$0]  (%p1141_p6), %s532_s8, 16, %s1215_s25, %s495_s26  }
 0x14a   : > { %s723_s23 = sshll.u32 %s1020_s19, 1  ;;  %s724_s7 = sshll.u32 %s1024_s20, 5 }
 0x14b   : > { %s513_s12 = sshll.u32 %s1175_s28, 4  ;;  %s510_s9 = sadd.s32 %s724_s7, %s723_s23  ;;  %s1240_s12 = int_to_ptr.vmem [resolvable:$true] %s513_s12 }
 0x14c   : > { %s725_s27 = sshll.u32 %s510_s9, 6  ;;  %s490_s0 = scalar_lea.sflag [#allocation4], %s1165_s11 }
 0x14d   : > { %s1245_s13 = scalar_lea.hbm %s1337_s2, %s725_s27  ;;  %s898_s1 = scalar_lea.vmem %s1240_s12, 128 }
 0x14e   : > { %p899_p9 = scmp.ne.s32.totalorder %s1240_s12, %s898_s1  ;;  %s1046_s19 = smov [#allocation3]  }
 0x14f   : > { %s902_s20 = sshll.u32 %s1046_s19, 4  ;;  %s903_s20 = int_to_ptr.vmem [resolvable:$false] %s902_s20 }
 0x150   : > { %p900_p10 = pnand %p899_p9, %p1141_p6  ;;  %s904_s28 = scalar_lea.vmem %s903_s20, 256 }
 0x151   : > { %p905_p12 = scmp.lt.s32.totalorder %s1240_s12, %s903_s20  ;;  %p906_p13 = scmp.lt.s32.totalorder %s904_s28, %s898_s1 }
 0x152   : > { %p901_p11 = pneg %p900_p10 }
 0x153   : > { %p907_p0 = por %p906_p13, %p905_p12 }
 0x155   : > { %p908_p1 = pnand %p907_p0, %p901_p11 }
 0x157   : > { %911 = shalt.err (!%p908_p1)
}
 0x158   : > { %s912_s8 = scalar_lea.hbm %s1245_s13, 128  ;;  %s916_s7 = scalar_lea.hbm %s1337_s2, 4096 }
 0x159   : > { %p913_p2 = scmp.ne.s32.totalorder %s1245_s13, %s912_s8  ;;  %p917_p5 = scmp.lt.u32.totalorder %s1245_s13, %s1337_s2 }
 0x15a   : > { %p918_p8 = scmp.lt.u32.totalorder %s916_s7, %s912_s8  ;;  %p920_p10 = scmp.lt.u32.totalorder %s912_s8, %s1245_s13 }
 0x15b   : > { %p914_p3 = pnand %p913_p2, %p1141_p6 }
 0x15c   : > { %p919_p9 = por %p918_p8, %p917_p5 }
 0x15d   : > { %p915_p4 = pneg %p914_p3 }
 0x15e   : > { %p921_p11 = por %p920_p10, %p919_p9 }
 0x160   : > { %p922_p12 = pnand %p921_p11, %p915_p4 }
 0x162   : > { %925 = shalt.err (!%p922_p12)
}
 0x163   : > { %s1047_s1 = smov 64   ;;  %s1048_s14 = smov 4  }
 0x164   : > { %766 = dma.vmem_to_hbm [thread:$0]  (%p1141_p6), %s1240_s12, 128, %s1245_s13, %s490_s0, %s1047_s1, %s1047_s1, %s1048_s14  }
 0x165   : > { %s1358_s18 = sshll.u32 %s1205_s6, 4  ;;  %s1359_s8 = scalar_lea.vmem [#allocation7], %s1165_s11 }
 0x166   : > { %s1276_s28 = scalar_lea.hbm %s1339_s4, %s1358_s18  ;;  %s546_s25 = sshll.u32 %s1359_s8, 4  ;;  %s547_s25 = int_to_ptr.vmem [resolvable:$true] %s546_s25 }
 0x167   : > { %s926_s23 = scalar_lea.vmem %s547_s25, 16  ;;  %s1049_s7 = smov [#allocation7]  }
 0x168   : > { %p927_p13 = scmp.ne.s32.totalorder %s547_s25, %s926_s23  ;;  %s930_s9 = sshll.u32 %s1049_s7, 4  ;;  %s931_s9 = int_to_ptr.vmem [resolvable:$false] %s930_s9 }
 0x169   : > { %s932_s27 = scalar_lea.vmem %s931_s9, 32  ;;  %p933_p2 = scmp.lt.s32.totalorder %s547_s25, %s931_s9 }
 0x16a   : > { %p928_p0 = pnand %p927_p13, %p1141_p6  ;;  %p934_p3 = scmp.lt.s32.totalorder %s932_s27, %s926_s23 }
 0x16c   : > { %p929_p1 = pneg %p928_p0  ;;  %p935_p4 = por %p934_p3, %p933_p2 }
 0x16e   : > { %p936_p5 = pnand %p935_p4, %p929_p1 }
 0x170   : > { %939 = shalt.err (!%p936_p5)
}
 0x171   : > { %s940_s0 = scalar_lea.hbm %s1276_s28, 16  ;;  %s944_s12 = scalar_lea.hbm %s1339_s4, 512 }
 0x172   : > { %p941_p8 = scmp.ne.s32.totalorder %s1276_s28, %s940_s0  ;;  %p945_p11 = scmp.lt.u32.totalorder %s1276_s28, %s1339_s4 }
 0x173   : > { %p946_p12 = scmp.lt.u32.totalorder %s944_s12, %s940_s0  ;;  %p948_p0 = scmp.lt.u32.totalorder %s940_s0, %s1276_s28 }
 0x174   : > { %p942_p9 = pnand %p941_p8, %p1141_p6 }
 0x175   : > { %p947_p13 = por %p946_p12, %p945_p11 }
 0x176   : > { %p943_p10 = pneg %p942_p9 }
 0x177   : > { %p949_p1 = por %p948_p0, %p947_p13 }
 0x179   : > { %p950_p2 = pnand %p949_p1, %p943_p10 }
 0x17b   : > { %953 = shalt.err (!%p950_p2)
}
 0x17c   : > { %768 = dma.vmem_to_hbm [thread:$0]  (%p1141_p6), %s547_s25, 16, %s1276_s28, %s495_s26  }
 0x17d PF: > { %p782_p3 = scmp.ge.s32.totalorder %s1040_s24, 2  ;;  %s558_s14 = sand.u32 1, %s1004_s15  }
 0x17e   : > { %s559_s18 = scalar_lea.sflag [#allocation4], %s558_s14 }
 0x17f   : > { %p773_p4 = pnand %p782_p3, %p1148_p7 }
 0x181   : > { %995 = dma.done.wait (!%p773_p4), %s559_s18, 128  }
 0x182   : > { %997 = vsyncadd (!%p773_p4), %s559_s18, 4294967168  ;;  %s1360_s19 = sadd.s32 4294967294, %s1040_s24  }
 0x183   : > { %s567_s20 = sand.u32 1, %s1360_s19  }
 0x184   : > { %s568_s8 = scalar_lea.sflag [#allocation6], %s567_s20 }
 0x185   : > { %999 = dma.done.wait (!%p773_p4), %s568_s8, 32  }
 0x186   : > { %1001 = vsyncadd (!%p773_p4), %s568_s8, 4294967264  ;;  %s21_s24 = sadd.s32 1, %s1040_s24   ;;  %s1361_s20 = sld [smem:[#allocation10_spill]] }
 0x187   : > { %p18_p6 = scmp.ge.s32.totalorder %s21_s24, 98   ;;  %s1362_s30 = sld [smem:[#allocation11_spill]] }
 0x188   : > { %s1363_s5 = sld [smem:[#allocation12_spill]]  ;;  %s1364_s23 = sld [smem:[#allocation13_spill]] }
 0x189   : > { %s1365_s15 = smov %s1008_s16  ;;  %s1366_s16 = smov %s1012_s17 }
 0x18a   : > { %s1367_s17 = smov %s1162_s10  ;;  %s1368_s18 = smov %s1028_s21 }
 0x18b   : > { %s1369_s19 = smov %s1032_s22  ;;  %20 = sbr.rel (!%p18_p6) target bundleno = 11 (0xb), region = 106 }
 0x18d   : > { %s1370_s21 = smov %s1362_s30 }
 0x18e   : > { %s1371_s22 = smov %s1363_s5 }
 0x192   :  { %580 = vsyncpa [#allocation4], 1 }
 0x193   :  { %582 = vsyncpa [#allocation4 + $0x1], 1 }
 0x194   :  { %583 = vsyncpa [#allocation6], 1 }
 0x195   :  { %585 = vsyncpa [#allocation6 + $0x1], 1 }

</bundles_post_ra>
